<compile_context>
chip_gen: v6e
topology: v6e:2x2x1
jax: 0.10.0
libtpu: 0.0.40
codegen_flags: <defaults>
</compile_context>

<pallas_src>
import functools

import jax
import jax.numpy as jnp
from jax.experimental import pallas as pl
from jax.experimental.pallas import tpu as pltpu


def _round_up(x, m):
    return (x + m - 1) // m * m


def _device_kind():
    try:
        return jax.devices()[0].device_kind.lower()
    except Exception:
        return ""


def _vmem_capacity_bytes():
    """Physical VMEM per TensorCore, with conservative per-generation fallbacks."""
    try:
        cap = getattr(pltpu.get_tpu_info(), "vmem_capacity_bytes", None)
        if cap:
            return int(cap)
    except Exception:
        pass
    kind = _device_kind()
    if any(v in kind for v in ("v4", "v5", "v6")):
        return 128 << 20
    return 64 << 20  # v7x: 64 MiB per TensorCore; safe lower bound otherwise.


def _vmem_estimate(tile_m, tk_ff, d_model, x_isz, w_isz, weight_bufs=2):
    """Conservative per-step VMEM footprint: counts all live buffers + intermediates."""
    io = 2 * 2 * tile_m * d_model * x_isz              # x tile + out tile, 2 buffers each
    w = weight_bufs * 2 * d_model * tk_ff * w_isz      # W1 chunk + W2 chunk
    b1 = weight_bufs * _round_up(tk_ff, 128) * 4       # b1 chunk (f32)
    small = 3 * 2 * _round_up(d_model, 128) * 4        # b2, gamma, beta (f32)
    acc = tile_m * d_model * 4                         # f32 accumulator scratch
    h = tile_m * tk_ff * (4 + w_isz)                   # f32 h + cast copy for 2nd matmul
    y_tmp = 3 * tile_m * d_model * 4                   # f32 y / centered / scaled temps
    return io + w + b1 + small + acc + h + y_tmp + (2 << 20)


def _select_tiling(n_rows, d_model, d_ff, x_isz, w_isz, budget, tile_m, tk_ff):
    kind = _device_kind()

    if tile_m is None:
        # v5e MXU is 4x128x128: 256-row granularity buys nothing there.
        tile_m = 128 if any(v in kind for v in ("v2", "v3", "v4", "v5")) else 256
        # v6e has 128 MiB VMEM: a larger row tile amortizes the ~0.35us per-step overhead
        # when the whole problem still fits with resident weights.
        if "v6" in kind and _vmem_estimate(512, d_ff, d_model, x_isz, w_isz) <= budget:
            tile_m = 512
    tile_m = max(8, min(tile_m, _round_up(n_rows, 8)))

    if tk_ff is None:
        if _vmem_estimate(tile_m, d_ff, d_model, x_isz, w_isz) <= budget:
            tk_ff = d_ff  # resident-weight single-chunk path
        else:
            divisors = [c for c in range(128, d_ff, 128) if d_ff % c == 0]
            fitting = [c for c in divisors
                       if _vmem_estimate(tile_m, c, d_model, x_isz, w_isz) <= budget]
            if fitting:
                tk_ff = max(fitting)
            elif divisors:
                tk_ff = divisors[0]
            else:
                tk_ff = d_ff

    if d_ff % tk_ff != 0:
        # TODO(synk): ragged d_ff chunks would accumulate garbage from the padded tail of
        # the last W1/W2 chunk; fall back to a single chunk instead of masking for now.
        tk_ff = d_ff
    return tile_m, tk_ff


def _ffn_kernel(x_ref, w1_ref, b1_ref, w2_ref, b2_ref, gamma_ref, beta_ref,
                o_ref, acc_ref, *, eps):
    k = pl.program_id(1)

    x_in = x_ref[...]                                              # (TM, d_model), native dtype

    # ---- w_1 chunk: x @ W1[:, k-chunk] + b1 chunk, then ReLU (f32) ----
    h = jnp.dot(x_in, w1_ref[...], preferred_element_type=jnp.float32)
    h = jnp.maximum(h + b1_ref[...].astype(jnp.float32), 0.0)      # (TM, tk_ff) f32
    # Cast back to the weight dtype so the second matmul also runs at full MXU rate.
    h = h.astype(w2_ref.dtype)

    # ---- w_2 chunk: accumulate partial product into f32 scratch ----
    partial = jnp.dot(h, w2_ref[...], preferred_element_type=jnp.float32)

    @pl.when(k == 0)
    def _():
        acc_ref[...] = partial

    @pl.when(k > 0)
    def _():
        acc_ref[...] = acc_ref[...] + partial

    # ---- epilogue on the last d_ff chunk: bias + dropout(identity) + residual + LN ----
    @pl.when(k == pl.num_programs(1) - 1)
    def _():
        y = acc_ref[...] + b2_ref[...].astype(jnp.float32) + x_in.astype(jnp.float32)
        d = y.shape[-1]
        inv_d = 1.0 / d
        # Single-pass statistics: var = E[y^2] - mean^2 (both reductions independent).
        s1 = jnp.sum(y, axis=-1, keepdims=True)
        s2 = jnp.sum(y * y, axis=-1, keepdims=True)
        mean = s1 * inv_d
        var = jnp.maximum(s2 * inv_d - mean * mean, 0.0)
        out = (y - mean) * jax.lax.rsqrt(var + eps)
        out = out * gamma_ref[...].astype(jnp.float32) + beta_ref[...].astype(jnp.float32)
        o_ref[...] = out.astype(o_ref.dtype)


def position_wise_feed_forward(x, w1, b1, w2, b2, gamma, beta, *,
                               eps=1e-6, tile_m=None, tk_ff=None,
                               compute_dtype=None, vmem_budget_bytes=None):
    """x: [B, S, d_model]; w1: [d_model, d_ff]; w2: [d_ff, d_model].

    tile_m / tk_ff default to generation- and VMEM-budget-aware choices.
    compute_dtype: optionally cast x / W1 / W2 (e.g. to bf16) for full MXU rate;
    accumulation and LayerNorm remain f32 and the output keeps x's original dtype.
    """
    B, S, d_model = x.shape
    d_ff = w1.shape[1]
    n_rows = B * S
    out_dtype = x.dtype

    x2d = x.reshape(n_rows, d_model)
    if compute_dtype is not None:
        x2d = x2d.astype(compute_dtype)
        w1 = w1.astype(compute_dtype)
        w2 = w2.astype(compute_dtype)

    b1_2d = b1.reshape(1, d_ff).astype(jnp.float32)
    b2_2d = b2.reshape(1, d_model).astype(jnp.float32)
    gamma_2d = gamma.reshape(1, d_model).astype(jnp.float32)
    beta_2d = beta.reshape(1, d_model).astype(jnp.float32)

    x_isz = jnp.dtype(x2d.dtype).itemsize
    w_isz = jnp.dtype(w1.dtype).itemsize

    cap = _vmem_capacity_bytes()
    budget = int(0.85 * cap) if vmem_budget_bytes is None else int(vmem_budget_bytes)

    tile_m, tk_ff = _select_tiling(n_rows, d_model, d_ff, x_isz, w_isz,
                                   budget, tile_m, tk_ff)
    num_row_tiles = pl.cdiv(n_rows, tile_m)   # ragged last block: padded reads, masked writes
    num_ff_chunks = d_ff // tk_ff

    est = _vmem_estimate(tile_m, tk_ff, d_model, x_isz, w_isz)
    vmem_limit = int(min(budget, max(est, 32 << 20)))

    def _call(single_buffer_consts):
        def spec(shape, index_map, *, constant=False):
            if constant and single_buffer_consts:
                # Constant block index -> one buffer is enough; halves resident VMEM.
                return pl.BlockSpec(shape, index_map, pipeline_mode=pl.Buffered(1))
            return pl.BlockSpec(shape, index_map)

        weights_const = num_ff_chunks == 1
        grid_spec = pltpu.PrefetchScalarGridSpec(
            num_scalar_prefetch=0,
            grid=(num_row_tiles, num_ff_chunks),
            in_specs=[
                spec((tile_m, d_model), lambda i, k: (i, 0)),                       # x tile
                spec((d_model, tk_ff), lambda i, k: (0, k), constant=weights_const),  # W1
                spec((1, tk_ff), lambda i, k: (0, k), constant=weights_const),        # b1
                spec((tk_ff, d_model), lambda i, k: (k, 0), constant=weights_const),  # W2
                spec((1, d_model), lambda i, k: (0, 0), constant=True),               # b2
                spec((1, d_model), lambda i, k: (0, 0), constant=True),               # gamma
                spec((1, d_model), lambda i, k: (0, 0), constant=True),               # beta
            ],
            out_specs=pl.BlockSpec((tile_m, d_model), lambda i, k: (i, 0)),
            scratch_shapes=[pltpu.VMEM((tile_m, d_model), jnp.float32)],
        )
        return pl.pallas_call(
            functools.partial(_ffn_kernel, eps=eps),
            out_shape=jax.ShapeDtypeStruct((n_rows, d_model), out_dtype),
            grid_spec=grid_spec,
            compiler_params=pltpu.CompilerParams(
                dimension_semantics=("parallel", "arbitrary"),
                vmem_limit_bytes=vmem_limit,
            ),
        )(x2d, w1, b1_2d, w2, b2_2d, gamma_2d, beta_2d)

    try:
        out2d = _call(True)
    except Exception:
        # pl.Buffered(1) (single-buffering of constant-index operands) is not available on
        # every JAX version; fall back to default double buffering.
        out2d = _call(False)

    return out2d.reshape(B, S, d_model)


def _reference(x, w1, b1, w2, b2, gamma, beta, eps=1e-6):
    """Pure-JAX reference mirroring the PyTorch forward (dropout = identity)."""
    h = jnp.maximum(x @ w1 + b1, 0.0)
    y = h @ w2 + b2
    y = y + x
    mean = jnp.mean(y, axis=-1, keepdims=True)
    var = jnp.mean((y - mean) ** 2, axis=-1, keepdims=True)
    return (y - mean) / jnp.sqrt(var + eps) * gamma + beta


if __name__ == "__main__":
    key = jax.random.PRNGKey(0)

    def make_inputs(k, B, S, d_model, d_ff):
        kx, kw1, kb1, kw2, kb2 = jax.random.split(k, 5)
        x = jax.random.normal(kx, (B, S, d_model), dtype=jnp.float32)
        # Linear weights stored pre-transposed so the kernel computes x @ W,
        # matching PyTorch's x @ W.T convention.
        w1 = jax.random.normal(kw1, (d_model, d_ff), dtype=jnp.float32) * 0.05
        b1 = jax.random.normal(kb1, (d_ff,), dtype=jnp.float32) * 0.05
        w2 = jax.random.normal(kw2, (d_ff, d_model), dtype=jnp.float32) * 0.05
        b2 = jax.random.normal(kb2, (d_model,), dtype=jnp.float32) * 0.05
        gamma = jnp.ones((d_model,), dtype=jnp.float32)
        beta = jnp.zeros((d_model,), dtype=jnp.float32)
        return x, w1, b1, w2, b2, gamma, beta

    k1, k2 = jax.random.split(key)

    # Case 1: small shapes, single d_ff chunk (resident weights), single row tile.
    args1 = make_inputs(k1, 2, 8, 128, 256)
    out1 = jax.block_until_ready(position_wise_feed_forward(*args1))
    ref1 = _reference(*args1)
    assert out1.shape == (2, 8, 128)
    assert jnp.allclose(out1, ref1, atol=1e-4, rtol=1e-4), "case1 mismatch vs reference"

    # Case 2: forces the streamed d_ff-split accumulator path (tk_ff=128 -> 4 chunks) and a
    # ragged last row tile (144 rows with tile_m=128 -> padded reads / masked writes).
    args2 = make_inputs(k2, 2, 72, 128, 512)
    out2 = jax.block_until_ready(
        position_wise_feed_forward(*args2, tile_m=128, tk_ff=128))
    ref2 = _reference(*args2)
    assert out2.shape == (2, 72, 128)
    assert jnp.allclose(out2, ref2, atol=1e-4, rtol=1e-4), "case2 mismatch vs reference"

    # Case 3: bf16 operand path (full-rate MXU), f32 accumulation/LayerNorm, f32 output.
    out3 = jax.block_until_ready(
        position_wise_feed_forward(*args1, compute_dtype=jnp.bfloat16))
    assert out3.dtype == jnp.float32
    assert jnp.allclose(out3, ref1, atol=5e-2, rtol=5e-2), "case3 (bf16) mismatch"

    print("KERNEL_OK")
</pallas_src>

<mosaic_0001>
module attributes {stable_mosaic.version = 11 : i64} {
  func.func @_ffn_kernel(%arg0: i32, %arg1: i32, %arg2: memref<16x128xf32, #tpu.memory_space<vmem>>, %arg3: memref<128x256xf32, #tpu.memory_space<vmem>>, %arg4: memref<1x256xf32, #tpu.memory_space<vmem>>, %arg5: memref<256x128xf32, #tpu.memory_space<vmem>>, %arg6: memref<1x128xf32, #tpu.memory_space<vmem>>, %arg7: memref<1x128xf32, #tpu.memory_space<vmem>>, %arg8: memref<1x128xf32, #tpu.memory_space<vmem>>, %arg9: memref<16x128xf32, #tpu.memory_space<vmem>>, %arg10: memref<16x128xf32, #tpu.memory_space<vmem>>) attributes {dimension_semantics = [#tpu.dimension_semantics<parallel>, #tpu.dimension_semantics<arbitrary>], iteration_bounds = array<i64: 1, 1>, scalar_prefetch = 0 : i64, scratch_operands = 1 : i64, tpu.core_type = #tpu.core_type<tc>, window_params = [{transform_indices = @transform_0, window_bounds = array<i64: 16, 128>}, {pipeline_mode = #tpu.pipeline_mode<synchronous>, transform_indices = @transform_1, window_bounds = array<i64: 128, 256>}, {pipeline_mode = #tpu.pipeline_mode<synchronous>, transform_indices = @transform_2, window_bounds = array<i64: 1, 256>}, {pipeline_mode = #tpu.pipeline_mode<synchronous>, transform_indices = @transform_3, window_bounds = array<i64: 256, 128>}, {pipeline_mode = #tpu.pipeline_mode<synchronous>, transform_indices = @transform_4, window_bounds = array<i64: 1, 128>}, {pipeline_mode = #tpu.pipeline_mode<synchronous>, transform_indices = @transform_5, window_bounds = array<i64: 1, 128>}, {pipeline_mode = #tpu.pipeline_mode<synchronous>, transform_indices = @transform_6, window_bounds = array<i64: 1, 128>}, {transform_indices = @transform_7, window_bounds = array<i64: 16, 128>}]} {
    %c0 = arith.constant 0 : index
    %c0_0 = arith.constant 0 : index
    %0 = vector.load %arg2[%c0, %c0_0] : memref<16x128xf32, #tpu.memory_space<vmem>>, vector<16x128xf32>
    %c0_1 = arith.constant 0 : index
    %c0_2 = arith.constant 0 : index
    %1 = vector.load %arg3[%c0_1, %c0_2] : memref<128x256xf32, #tpu.memory_space<vmem>>, vector<128x256xf32>
    %cst = arith.constant dense<0.000000e+00> : vector<16x256xf32>
    %2 = tpu.matmul %0, %1, %cst {dimension_numbers = #tpu.dot_dimension_numbers<[1], [0], [0], [1], [0, 0, 1, 1], [], []>} : vector<16x128xf32>, vector<128x256xf32>, vector<16x256xf32> -> vector<16x256xf32>
    %c0_3 = arith.constant 0 : index
    %c0_4 = arith.constant 0 : index
    %3 = vector.load %arg4[%c0_3, %c0_4] : memref<1x256xf32, #tpu.memory_space<vmem>>, vector<1x256xf32>
    %4 = vector.broadcast %3 : vector<1x256xf32> to vector<16x256xf32>
    %5 = arith.addf %2, %4 : vector<16x256xf32>
    %cst_5 = arith.constant 0.000000e+00 : f32
    %6 = vector.broadcast %cst_5 : f32 to vector<16x256xf32>
    %7 = arith.maximumf %5, %6 : vector<16x256xf32>
    %c0_6 = arith.constant 0 : index
    %c0_7 = arith.constant 0 : index
    %8 = vector.load %arg5[%c0_6, %c0_7] : memref<256x128xf32, #tpu.memory_space<vmem>>, vector<256x128xf32>
    %cst_8 = arith.constant dense<0.000000e+00> : vector<16x128xf32>
    %9 = tpu.matmul %7, %8, %cst_8 {dimension_numbers = #tpu.dot_dimension_numbers<[1], [0], [0], [1], [0, 0, 1, 1], [], []>} : vector<16x256xf32>, vector<256x128xf32>, vector<16x128xf32> -> vector<16x128xf32>
    %c0_i32 = arith.constant 0 : i32
    %10 = arith.cmpi eq, %arg1, %c0_i32 : i32
    %11 = arith.extui %10 : i1 to i32
    %c0_i32_9 = arith.constant 0 : i32
    %12 = arith.cmpi ne, %11, %c0_i32_9 : i32
    scf.if %12 {
      %c0_14 = arith.constant 0 : index
      %c0_15 = arith.constant 0 : index
      %19 = vector.load %arg10[%c0_14, %c0_15] : memref<16x128xf32, #tpu.memory_space<vmem>>, vector<16x128xf32>
      tpu.vector_store %arg10[%c0_14, %c0_15], %9 {strides = array<i32>} : memref<16x128xf32, #tpu.memory_space<vmem>>, vector<16x128xf32>,
    } else {
    }
    %c0_i32_10 = arith.constant 0 : i32
    %13 = arith.cmpi sgt, %arg1, %c0_i32_10 : i32
    %14 = arith.extui %13 : i1 to i32
    %c0_i32_11 = arith.constant 0 : i32
    %15 = arith.cmpi ne, %14, %c0_i32_11 : i32
    scf.if %15 {
      %c0_14 = arith.constant 0 : index
      %c0_15 = arith.constant 0 : index
      %19 = vector.load %arg10[%c0_14, %c0_15] : memref<16x128xf32, #tpu.memory_space<vmem>>, vector<16x128xf32>
      %20 = arith.addf %19, %9 : vector<16x128xf32>
      %c0_16 = arith.constant 0 : index
      %c0_17 = arith.constant 0 : index
      %21 = vector.load %arg10[%c0_16, %c0_17] : memref<16x128xf32, #tpu.memory_space<vmem>>, vector<16x128xf32>
      tpu.vector_store %arg10[%c0_16, %c0_17], %20 {strides = array<i32>} : memref<16x128xf32, #tpu.memory_space<vmem>>, vector<16x128xf32>,
    } else {
    }
    %c0_i32_12 = arith.constant 0 : i32
    %16 = arith.cmpi eq, %arg1, %c0_i32_12 : i32
    %17 = arith.extui %16 : i1 to i32
    %c0_i32_13 = arith.constant 0 : i32
    %18 = arith.cmpi ne, %17, %c0_i32_13 : i32
    scf.if %18 {
      %c0_14 = arith.constant 0 : index
      %c0_15 = arith.constant 0 : index
      %19 = vector.load %arg10[%c0_14, %c0_15] : memref<16x128xf32, #tpu.memory_space<vmem>>, vector<16x128xf32>
      %c0_16 = arith.constant 0 : index
      %c0_17 = arith.constant 0 : index
      %20 = vector.load %arg6[%c0_16, %c0_17] : memref<1x128xf32, #tpu.memory_space<vmem>>, vector<1x128xf32>
      %21 = vector.broadcast %20 : vector<1x128xf32> to vector<16x128xf32>
      %22 = arith.addf %19, %21 : vector<16x128xf32>
      %23 = arith.addf %22, %0 : vector<16x128xf32>
      %cst_18 = arith.constant dense<0.000000e+00> : vector<16xf32>
      %24 = vector.multi_reduction <add>, %23, %cst_18 [1] : vector<16x128xf32> to vector<16xf32>
      %25 = vector.shape_cast %24 : vector<16xf32> to vector<16x1xf32>
      %26 = arith.mulf %23, %23 : vector<16x128xf32>
      %cst_19 = arith.constant dense<0.000000e+00> : vector<16xf32>
      %27 = vector.multi_reduction <add>, %26, %cst_19 [1] : vector<16x128xf32> to vector<16xf32>
      %28 = vector.shape_cast %27 : vector<16xf32> to vector<16x1xf32>
      %cst_20 = arith.constant 7.812500e-03 : f32
      %29 = vector.broadcast %cst_20 : f32 to vector<16x1xf32>
      %30 = arith.mulf %25, %29 : vector<16x1xf32>
      %cst_21 = arith.constant 7.812500e-03 : f32
      %31 = vector.broadcast %cst_21 : f32 to vector<16x1xf32>
      %32 = arith.mulf %28, %31 : vector<16x1xf32>
      %33 = arith.mulf %30, %30 : vector<16x1xf32>
      %34 = arith.subf %32, %33 : vector<16x1xf32>
      %cst_22 = arith.constant 0.000000e+00 : f32
      %35 = vector.broadcast %cst_22 : f32 to vector<16x1xf32>
      %36 = arith.maximumf %34, %35 : vector<16x1xf32>
      %37 = vector.broadcast %30 : vector<16x1xf32> to vector<16x128xf32>
      %38 = arith.subf %23, %37 : vector<16x128xf32>
      %cst_23 = arith.constant 9.99999997E-7 : f32
      %39 = vector.broadcast %cst_23 : f32 to vector<16x1xf32>
      %40 = arith.addf %36, %39 : vector<16x1xf32>
      %41 = math.rsqrt %40 : vector<16x1xf32>
      %42 = vector.broadcast %41 : vector<16x1xf32> to vector<16x128xf32>
      %43 = arith.mulf %38, %42 : vector<16x128xf32>
      %c0_24 = arith.constant 0 : index
      %c0_25 = arith.constant 0 : index
      %44 = vector.load %arg7[%c0_24, %c0_25] : memref<1x128xf32, #tpu.memory_space<vmem>>, vector<1x128xf32>
      %45 = vector.broadcast %44 : vector<1x128xf32> to vector<16x128xf32>
      %46 = arith.mulf %43, %45 : vector<16x128xf32>
      %c0_26 = arith.constant 0 : index
      %c0_27 = arith.constant 0 : index
      %47 = vector.load %arg8[%c0_26, %c0_27] : memref<1x128xf32, #tpu.memory_space<vmem>>, vector<1x128xf32>
      %48 = vector.broadcast %47 : vector<1x128xf32> to vector<16x128xf32>
      %49 = arith.addf %46, %48 : vector<16x128xf32>
      %c0_28 = arith.constant 0 : index
      %c0_29 = arith.constant 0 : index
      %50 = vector.load %arg9[%c0_28, %c0_29] : memref<16x128xf32, #tpu.memory_space<vmem>>, vector<16x128xf32>
      tpu.vector_store %arg9[%c0_28, %c0_29], %49 {strides = array<i32>} : memref<16x128xf32, #tpu.memory_space<vmem>>, vector<16x128xf32>,
    } else {
    }
    return
  }
  func.func @transform_0(%arg0: i32, %arg1: i32) -> (i32, i32) {
    %c0_i32 = arith.constant 0 : i32
    %c0_i32_0 = arith.constant 0 : i32
    return %arg0, %c0_i32 : i32, i32
  }
  func.func @transform_1(%arg0: i32, %arg1: i32) -> (i32, i32) {
    %c0_i32 = arith.constant 0 : i32
    %c0_i32_0 = arith.constant 0 : i32
    return %c0_i32, %arg1 : i32, i32
  }
  func.func @transform_2(%arg0: i32, %arg1: i32) -> (i32, i32) {
    %c0_i32 = arith.constant 0 : i32
    %c0_i32_0 = arith.constant 0 : i32
    return %c0_i32, %arg1 : i32, i32
  }
  func.func @transform_3(%arg0: i32, %arg1: i32) -> (i32, i32) {
    %c0_i32 = arith.constant 0 : i32
    %c0_i32_0 = arith.constant 0 : i32
    return %arg1, %c0_i32 : i32, i32
  }
  func.func @transform_4(%arg0: i32, %arg1: i32) -> (i32, i32) {
    %c0_i32 = arith.constant 0 : i32
    %c0_i32_0 = arith.constant 0 : i32
    %c0_i32_1 = arith.constant 0 : i32
    return %c0_i32, %c0_i32_0 : i32, i32
  }
  func.func @transform_5(%arg0: i32, %arg1: i32) -> (i32, i32) {
    %c0_i32 = arith.constant 0 : i32
    %c0_i32_0 = arith.constant 0 : i32
    %c0_i32_1 = arith.constant 0 : i32
    return %c0_i32, %c0_i32_0 : i32, i32
  }
  func.func @transform_6(%arg0: i32, %arg1: i32) -> (i32, i32) {
    %c0_i32 = arith.constant 0 : i32
    %c0_i32_0 = arith.constant 0 : i32
    %c0_i32_1 = arith.constant 0 : i32
    return %c0_i32, %c0_i32_0 : i32, i32
  }
  func.func @transform_7(%arg0: i32, %arg1: i32) -> (i32, i32) {
    %c0_i32 = arith.constant 0 : i32
    %c0_i32_0 = arith.constant 0 : i32
    return %arg0, %c0_i32 : i32, i32
  }
}

module attributes {stable_mosaic.version = 11 : i64} {
  func.func @_ffn_kernel(%arg0: i32, %arg1: i32, %arg2: memref<16x128xf32, #tpu.memory_space<vmem>>, %arg3: memref<128x256xf32, #tpu.memory_space<vmem>>, %arg4: memref<1x256xf32, #tpu.memory_space<vmem>>, %arg5: memref<256x128xf32, #tpu.memory_space<vmem>>, %arg6: memref<1x128xf32, #tpu.memory_space<vmem>>, %arg7: memref<1x128xf32, #tpu.memory_space<vmem>>, %arg8: memref<1x128xf32, #tpu.memory_space<vmem>>, %arg9: memref<16x128xf32, #tpu.memory_space<vmem>>, %arg10: memref<16x128xf32, #tpu.memory_space<vmem>>) attributes {dimension_semantics = [#tpu.dimension_semantics<parallel>, #tpu.dimension_semantics<arbitrary>], iteration_bounds = array<i64: 1, 1>, scalar_prefetch = 0 : i64, scratch_operands = 1 : i64, tpu.core_type = #tpu.core_type<tc>, window_params = [{transform_indices = @transform_0, window_bounds = array<i64: 16, 128>}, {transform_indices = @transform_1, window_bounds = array<i64: 128, 256>}, {transform_indices = @transform_2, window_bounds = array<i64: 1, 256>}, {transform_indices = @transform_3, window_bounds = array<i64: 256, 128>}, {pipeline_mode = #tpu.pipeline_mode<synchronous>, transform_indices = @transform_4, window_bounds = array<i64: 1, 128>}, {pipeline_mode = #tpu.pipeline_mode<synchronous>, transform_indices = @transform_5, window_bounds = array<i64: 1, 128>}, {pipeline_mode = #tpu.pipeline_mode<synchronous>, transform_indices = @transform_6, window_bounds = array<i64: 1, 128>}, {transform_indices = @transform_7, window_bounds = array<i64: 16, 128>}]} {
    %c0 = arith.constant 0 : index
    %c0_0 = arith.constant 0 : index
    %0 = vector.load %arg2[%c0, %c0_0] : memref<16x128xf32, #tpu.memory_space<vmem>>, vector<16x128xf32>
    %c0_1 = arith.constant 0 : index
    %c0_2 = arith.constant 0 : index
    %1 = vector.load %arg3[%c0_1, %c0_2] : memref<128x256xf32, #tpu.memory_space<vmem>>, vector<128x256xf32>
    %cst = arith.constant dense<0.000000e+00> : vector<16x256xf32>
    %2 = tpu.matmul %0, %1, %cst {dimension_numbers = #tpu.dot_dimension_numbers<[1], [0], [0], [1], [0, 0, 1, 1], [], []>} : vector<16x128xf32>, vector<128x256xf32>, vector<16x256xf32> -> vector<16x256xf32>
    %c0_3 = arith.constant 0 : index
    %c0_4 = arith.constant 0 : index
    %3 = vector.load %arg4[%c0_3, %c0_4] : memref<1x256xf32, #tpu.memory_space<vmem>>, vector<1x256xf32>
    %4 = vector.broadcast %3 : vector<1x256xf32> to vector<16x256xf32>
    %5 = arith.addf %2, %4 : vector<16x256xf32>
    %cst_5 = arith.constant 0.000000e+00 : f32
    %6 = vector.broadcast %cst_5 : f32 to vector<16x256xf32>
    %7 = arith.maximumf %5, %6 : vector<16x256xf32>
    %c0_6 = arith.constant 0 : index
    %c0_7 = arith.constant 0 : index
    %8 = vector.load %arg5[%c0_6, %c0_7] : memref<256x128xf32, #tpu.memory_space<vmem>>, vector<256x128xf32>
    %cst_8 = arith.constant dense<0.000000e+00> : vector<16x128xf32>
    %9 = tpu.matmul %7, %8, %cst_8 {dimension_numbers = #tpu.dot_dimension_numbers<[1], [0], [0], [1], [0, 0, 1, 1], [], []>} : vector<16x256xf32>, vector<256x128xf32>, vector<16x128xf32> -> vector<16x128xf32>
    %c0_i32 = arith.constant 0 : i32
    %10 = arith.cmpi eq, %arg1, %c0_i32 : i32
    %11 = arith.extui %10 : i1 to i32
    %c0_i32_9 = arith.constant 0 : i32
    %12 = arith.cmpi ne, %11, %c0_i32_9 : i32
    scf.if %12 {
      %c0_14 = arith.constant 0 : index
      %c0_15 = arith.constant 0 : index
      %19 = vector.load %arg10[%c0_14, %c0_15] : memref<16x128xf32, #tpu.memory_space<vmem>>, vector<16x128xf32>
      tpu.vector_store %arg10[%c0_14, %c0_15], %9 {strides = array<i32>} : memref<16x128xf32, #tpu.memory_space<vmem>>, vector<16x128xf32>,
    } else {
    }
    %c0_i32_10 = arith.constant 0 : i32
    %13 = arith.cmpi sgt, %arg1, %c0_i32_10 : i32
    %14 = arith.extui %13 : i1 to i32
    %c0_i32_11 = arith.constant 0 : i32
    %15 = arith.cmpi ne, %14, %c0_i32_11 : i32
    scf.if %15 {
      %c0_14 = arith.constant 0 : index
      %c0_15 = arith.constant 0 : index
      %19 = vector.load %arg10[%c0_14, %c0_15] : memref<16x128xf32, #tpu.memory_space<vmem>>, vector<16x128xf32>
      %20 = arith.addf %19, %9 : vector<16x128xf32>
      %c0_16 = arith.constant 0 : index
      %c0_17 = arith.constant 0 : index
      %21 = vector.load %arg10[%c0_16, %c0_17] : memref<16x128xf32, #tpu.memory_space<vmem>>, vector<16x128xf32>
      tpu.vector_store %arg10[%c0_16, %c0_17], %20 {strides = array<i32>} : memref<16x128xf32, #tpu.memory_space<vmem>>, vector<16x128xf32>,
    } else {
    }
    %c0_i32_12 = arith.constant 0 : i32
    %16 = arith.cmpi eq, %arg1, %c0_i32_12 : i32
    %17 = arith.extui %16 : i1 to i32
    %c0_i32_13 = arith.constant 0 : i32
    %18 = arith.cmpi ne, %17, %c0_i32_13 : i32
    scf.if %18 {
      %c0_14 = arith.constant 0 : index
      %c0_15 = arith.constant 0 : index
      %19 = vector.load %arg10[%c0_14, %c0_15] : memref<16x128xf32, #tpu.memory_space<vmem>>, vector<16x128xf32>
      %c0_16 = arith.constant 0 : index
      %c0_17 = arith.constant 0 : index
      %20 = vector.load %arg6[%c0_16, %c0_17] : memref<1x128xf32, #tpu.memory_space<vmem>>, vector<1x128xf32>
      %21 = vector.broadcast %20 : vector<1x128xf32> to vector<16x128xf32>
      %22 = arith.addf %19, %21 : vector<16x128xf32>
      %23 = arith.addf %22, %0 : vector<16x128xf32>
      %cst_18 = arith.constant dense<0.000000e+00> : vector<16xf32>
      %24 = vector.multi_reduction <add>, %23, %cst_18 [1] : vector<16x128xf32> to vector<16xf32>
      %25 = vector.shape_cast %24 : vector<16xf32> to vector<16x1xf32>
      %26 = arith.mulf %23, %23 : vector<16x128xf32>
      %cst_19 = arith.constant dense<0.000000e+00> : vector<16xf32>
      %27 = vector.multi_reduction <add>, %26, %cst_19 [1] : vector<16x128xf32> to vector<16xf32>
      %28 = vector.shape_cast %27 : vector<16xf32> to vector<16x1xf32>
      %cst_20 = arith.constant 7.812500e-03 : f32
      %29 = vector.broadcast %cst_20 : f32 to vector<16x1xf32>
      %30 = arith.mulf %25, %29 : vector<16x1xf32>
      %cst_21 = arith.constant 7.812500e-03 : f32
      %31 = vector.broadcast %cst_21 : f32 to vector<16x1xf32>
      %32 = arith.mulf %28, %31 : vector<16x1xf32>
      %33 = arith.mulf %30, %30 : vector<16x1xf32>
      %34 = arith.subf %32, %33 : vector<16x1xf32>
      %cst_22 = arith.constant 0.000000e+00 : f32
      %35 = vector.broadcast %cst_22 : f32 to vector<16x1xf32>
      %36 = arith.maximumf %34, %35 : vector<16x1xf32>
      %37 = vector.broadcast %30 : vector<16x1xf32> to vector<16x128xf32>
      %38 = arith.subf %23, %37 : vector<16x128xf32>
      %cst_23 = arith.constant 9.99999997E-7 : f32
      %39 = vector.broadcast %cst_23 : f32 to vector<16x1xf32>
      %40 = arith.addf %36, %39 : vector<16x1xf32>
      %41 = math.rsqrt %40 : vector<16x1xf32>
      %42 = vector.broadcast %41 : vector<16x1xf32> to vector<16x128xf32>
      %43 = arith.mulf %38, %42 : vector<16x128xf32>
      %c0_24 = arith.constant 0 : index
      %c0_25 = arith.constant 0 : index
      %44 = vector.load %arg7[%c0_24, %c0_25] : memref<1x128xf32, #tpu.memory_space<vmem>>, vector<1x128xf32>
      %45 = vector.broadcast %44 : vector<1x128xf32> to vector<16x128xf32>
      %46 = arith.mulf %43, %45 : vector<16x128xf32>
      %c0_26 = arith.constant 0 : index
      %c0_27 = arith.constant 0 : index
      %47 = vector.load %arg8[%c0_26, %c0_27] : memref<1x128xf32, #tpu.memory_space<vmem>>, vector<1x128xf32>
      %48 = vector.broadcast %47 : vector<1x128xf32> to vector<16x128xf32>
      %49 = arith.addf %46, %48 : vector<16x128xf32>
      %c0_28 = arith.constant 0 : index
      %c0_29 = arith.constant 0 : index
      %50 = vector.load %arg9[%c0_28, %c0_29] : memref<16x128xf32, #tpu.memory_space<vmem>>, vector<16x128xf32>
      tpu.vector_store %arg9[%c0_28, %c0_29], %49 {strides = array<i32>} : memref<16x128xf32, #tpu.memory_space<vmem>>, vector<16x128xf32>,
    } else {
    }
    return
  }
  func.func @transform_0(%arg0: i32, %arg1: i32) -> (i32, i32) {
    %c0_i32 = arith.constant 0 : i32
    %c0_i32_0 = arith.constant 0 : i32
    return %arg0, %c0_i32 : i32, i32
  }
  func.func @transform_1(%arg0: i32, %arg1: i32) -> (i32, i32) {
    %c0_i32 = arith.constant 0 : i32
    %c0_i32_0 = arith.constant 0 : i32
    return %c0_i32, %arg1 : i32, i32
  }
  func.func @transform_2(%arg0: i32, %arg1: i32) -> (i32, i32) {
    %c0_i32 = arith.constant 0 : i32
    %c0_i32_0 = arith.constant 0 : i32
    return %c0_i32, %arg1 : i32, i32
  }
  func.func @transform_3(%arg0: i32, %arg1: i32) -> (i32, i32) {
    %c0_i32 = arith.constant 0 : i32
    %c0_i32_0 = arith.constant 0 : i32
    return %arg1, %c0_i32 : i32, i32
  }
  func.func @transform_4(%arg0: i32, %arg1: i32) -> (i32, i32) {
    %c0_i32 = arith.constant 0 : i32
    %c0_i32_0 = arith.constant 0 : i32
    %c0_i32_1 = arith.constant 0 : i32
    return %c0_i32, %c0_i32_0 : i32, i32
  }
  func.func @transform_5(%arg0: i32, %arg1: i32) -> (i32, i32) {
    %c0_i32 = arith.constant 0 : i32
    %c0_i32_0 = arith.constant 0 : i32
    %c0_i32_1 = arith.constant 0 : i32
    return %c0_i32, %c0_i32_0 : i32, i32
  }
  func.func @transform_6(%arg0: i32, %arg1: i32) -> (i32, i32) {
    %c0_i32 = arith.constant 0 : i32
    %c0_i32_0 = arith.constant 0 : i32
    %c0_i32_1 = arith.constant 0 : i32
    return %c0_i32, %c0_i32_0 : i32, i32
  }
  func.func @transform_7(%arg0: i32, %arg1: i32) -> (i32, i32) {
    %c0_i32 = arith.constant 0 : i32
    %c0_i32_0 = arith.constant 0 : i32
    return %arg0, %c0_i32 : i32, i32
  }
}

</mosaic_0001>

<bundles_post_ra>
// kernel: tpu_custom_call.1
= control target key start
LH: loop header
LB: loop body
LE: loop exit
PB: predicated region body
PF: predicated region fallthrough
CT: control target
= control target key end

     0   :  { %12 = vsyncpa [#allocation4], 0  ;;  %s628_s0 = inlined_call_operand.hbm [shape: f32[16,128], index: 0, kind: input, shape index: {}]   ;;  %s629_s1 = inlined_call_operand.hbm [shape: f32[128,256], index: 1, kind: input, shape index: {}]   ;;  %s630_s2 = inlined_call_operand.vmem [shape: f32[1,256], index: 2, kind: input, shape index: {}]   ;;  %s631_s3 = inlined_call_operand.hbm [shape: f32[256,128], index: 3, kind: input, shape index: {}]   ;;  %s632_s4 = inlined_call_operand.vmem [shape: f32[1,128], index: 4, kind: input, shape index: {}]   ;;  %s633_s5 = inlined_call_operand.vmem [shape: f32[1,128], index: 5, kind: input, shape index: {}]   ;;  %s634_s6 = inlined_call_operand.vmem [shape: f32[1,128], index: 6, kind: input, shape index: {}]   ;;  %s635_s7 = inlined_call_operand.hbm [shape: f32[16,128], index: 7, kind: output, shape index: {}]  }
   0x1   :  { %13 = vsyncpa [#allocation7], 0 }
   0x2   :  { %14 = vsyncpa [#allocation5], 0  ;;  %s540_s24 = smov [#allocation6]  }
   0x3   :  { %s32_s25 = sshll.u32 %s540_s24, 4  ;;  %s33_s25 = int_to_ptr.vmem [resolvable:$true] %s32_s25 }
   0x4   :  { %s462_s26 = scalar_lea.vmem %s33_s25, 4096  ;;  %p467_p1 = scmp.lt.s32.totalorder %s33_s25, %s33_s25 }
   0x5   :  { %p463_p0 = scmp.ne.s32.totalorder %s33_s25, %s462_s26  ;;  %p468_p2 = scmp.lt.s32.totalorder %s462_s26, %s462_s26 }
   0x7   :  { %p469_p3 = por %p468_p2, %p467_p1 }
   0x9   :  { %p470_p4 = pnand %p469_p3, %p463_p0 }
   0xb   :  { %473 = shalt.err (!%p470_p4)
}
   0xc   :  { %s541_s27 = smov 256   ;;  %s542_s28 = smov 16  }
   0xd   :  { %38 = dma.hbm_to_vmem [thread:$0]  %s629_s1, 4096, %s33_s25, [#allocation7], %s541_s27, %s541_s27, %s542_s28  }
   0xe   :  { %s543_s8 = smov [#allocation3]  }
   0xf   :  { %s20_s9 = sshll.u32 %s543_s8, 4  ;;  %s21_s9 = int_to_ptr.vmem [resolvable:$true] %s20_s9 }
  0x10   :  { %s482_s10 = scalar_lea.vmem %s21_s9, 256  ;;  %p487_p6 = scmp.lt.s32.totalorder %s21_s9, %s21_s9 }
  0x11   :  { %p483_p5 = scmp.ne.s32.totalorder %s21_s9, %s482_s10  ;;  %p488_p7 = scmp.lt.s32.totalorder %s482_s10, %s482_s10 }
  0x13   :  { %p489_p8 = por %p488_p7, %p487_p6 }
  0x15   :  { %p490_p9 = pnand %p489_p8, %p483_p5 }
  0x17   :  { %493 = shalt.err (!%p490_p9)
}
  0x18   :  { %s544_s11 = smov 128   ;;  %s545_s12 = smov 8  }
  0x19   :  { %26 = dma.hbm_to_vmem [thread:$0]  %s628_s0, 256, %s21_s9, [#allocation4], %s544_s11, %s544_s11, %s545_s12  }
  0x1a   :  { %s546_s1 = smov [#allocation8]  }
  0x1b   :  { %s46_s15 = sshll.u32 %s546_s1, 4  ;;  %s47_s15 = int_to_ptr.vmem [resolvable:$true] %s46_s15 }
  0x1c   :  { %s502_s16 = scalar_lea.vmem %s47_s15, 4096  ;;  %p507_p11 = scmp.lt.s32.totalorder %s47_s15, %s47_s15 }
  0x1d   :  { %p503_p10 = scmp.ne.s32.totalorder %s47_s15, %s502_s16  ;;  %p508_p12 = scmp.lt.s32.totalorder %s502_s16, %s502_s16 }
  0x1f   :  { %p509_p13 = por %p508_p12, %p507_p11 }
  0x21   :  { %p510_p0 = pnand %p509_p13, %p503_p10 }
  0x23   :  { %513 = shalt.err (!%p510_p0)
}
  0x24   :  { %52 = dma.hbm_to_vmem [thread:$0]  %s631_s3, 4096, %s47_s15, [#allocation7], %s544_s11, %s544_s11, %s545_s12  }
  0x25   :  { %534 = dma.done.wait [#allocation4], 256  }
  0x26   :  { %535 = vsyncadd [#allocation4], 4294967040 }
  0x27   :  { %536 = dma.done.wait [#allocation7], 8192  }
  0x28   :  { %537 = vsyncadd [#allocation7], 4294959104  ;;  %v547_v0 = vmov 0.0   ;;  %v101_v1 = vld [vmem:[#allocation6 + $0xf8] sm:$0xff]  ;;  %v100_v2 = vld [vmem:[#allocation6 + $0xf0] sm:$0xff]  ;;  %s548_s23 = smov [#allocation9]  }
  0x29   :  { %178 = vmatprep.mubr.f32.mxu0 %v547_v0  ;;  %v99_v3 = vld [vmem:[#allocation6 + $0xe8] sm:$0xff]  ;;  %114 = vmatprep.subr.mxu0 %v101_v1  ;;  %v98_v4 = vld [vmem:[#allocation6 + $0xe0] sm:$0xff]  ;;  %v97_v5 = vld [vmem:[#allocation6 + $0xd8] sm:$0xff]  ;;  %s387_s24 = sshll.u32 %s548_s23, 4  ;;  %s388_s24 = int_to_ptr.vmem [resolvable:$true] %s387_s24 }
  0x2a   :  { %115 = vmatpush1.msra.mxu0 %v100_v2  ;;  %v96_v6 = vld [vmem:[#allocation6 + $0xd0] sm:$0xff]  ;;  %v95_v7 = vld [vmem:[#allocation6 + $0xc8] sm:$0xff]  ;;  %v94_v8 = vld [vmem:[#allocation6 + $0xc0] sm:$0xff]  ;;  %s514_s25 = scalar_lea.vmem %s388_s24, 256  ;;  %p519_p2 = scmp.lt.s32.totalorder %s388_s24, %s388_s24 }
  0x2b   :  { %116 = vmatprep.subr.mxu0 %v99_v3  ;;  %v93_v9 = vld [vmem:[#allocation6 + $0xb8] sm:$0xff]  ;;  %v92_v10 = vld [vmem:[#allocation6 + $0xb0] sm:$0xff]  ;;  %v91_v11 = vld [vmem:[#allocation6 + $0xa8] sm:$0xff]  ;;  %p515_p1 = scmp.ne.s32.totalorder %s388_s24, %s514_s25  ;;  %p520_p3 = scmp.lt.s32.totalorder %s514_s25, %s514_s25 }
  0x2c   :  { %117 = vmatpush1.msra.mxu0 %v98_v4  ;;  %v90_v12 = vld [vmem:[#allocation6 + $0xa0] sm:$0xff]  ;;  %v89_v13 = vld [vmem:[#allocation6 + $0x98] sm:$0xff]  ;;  %v88_v14 = vld [vmem:[#allocation6 + $0x90] sm:$0xff] }
  0x2d   :  { %118 = vmatprep.subr.mxu0 %v97_v5  ;;  %v226_v15 = vld [vmem:[#allocation8 + $0xf8] sm:$0xff]  ;;  %v87_v17 = vld [vmem:[#allocation6 + $0x88] sm:$0xff]  ;;  %v225_v18 = vld [vmem:[#allocation8 + $0xf0] sm:$0xff]  ;;  %p521_p4 = por %p520_p3, %p519_p2 }
  0x2e   :  { %119 = vmatpush1.msra.mxu0 %v96_v6  ;;  %v210_v16 = vld [vmem:[#allocation8 + $0x78] sm:$0xff]  ;;  %403 = vmatprep.subr.mxu1 %v226_v15  ;;  %v209_v19 = vld [vmem:[#allocation8 + $0x70] sm:$0xff]  ;;  %v86_v20 = vld [vmem:[#allocation6 + $0x80] sm:$0xff] }
  0x2f   :  { %120 = vmatprep.subr.mxu0 %v95_v7  ;;  %404 = vmatpush3.msra.mxu1 %v210_v16  ;;  %v224_v21 = vld [vmem:[#allocation8 + $0xe8] sm:$0xff]  ;;  %v85_v22 = vld [vmem:[#allocation6 + $0x78] sm:$0xff]  ;;  %v84_v24 = vld [vmem:[#allocation6 + $0x70] sm:$0xff]  ;;  %p522_p5 = pnand %p521_p4, %p515_p1 }
  0x30   :  { %121 = vmatpush1.msra.mxu0 %v94_v8  ;;  %405 = vmatprep.subr.mxu1 %v225_v18  ;;  %v208_v23 = vld [vmem:[#allocation8 + $0x68] sm:$0xff]  ;;  %v223_v25 = vld [vmem:[#allocation8 + $0xe0] sm:$0xff]  ;;  %v222_v29 = vld [vmem:[#allocation8 + $0xd8] sm:$0xff] }
  0x31   :  { %122 = vmatprep.subr.mxu0 %v93_v9  ;;  %406 = vmatpush3.msra.mxu1 %v209_v19  ;;  %v83_v26 = vld [vmem:[#allocation6 + $0x68] sm:$0xff]  ;;  %v207_v27 = vld [vmem:[#allocation8 + $0x60] sm:$0xff]  ;;  %v81_v30 = vld [vmem:[#allocation6 + $0x58] sm:$0xff] }
  0x32   :  { %123 = vmatpush1.msra.mxu0 %v92_v10  ;;  %407 = vmatprep.subr.mxu1 %v224_v21  ;;  %v82_v28 = vld [vmem:[#allocation6 + $0x60] sm:$0xff]  ;;  %v206_v31 = vld [vmem:[#allocation8 + $0x58] sm:$0xff]  ;;  %v80_v32 = vld [vmem:[#allocation6 + $0x50] sm:$0xff] }
  0x33   :  { %124 = vmatprep.subr.mxu0 %v91_v11  ;;  %408 = vmatpush3.msra.mxu1 %v208_v23  ;;  %v221_v33 = vld [vmem:[#allocation8 + $0xd0] sm:$0xff]  ;;  %v79_v34 = vld [vmem:[#allocation6 + $0x48] sm:$0xff]  ;;  %v78_v36 = vld [vmem:[#allocation6 + $0x40] sm:$0xff] }
  0x34   :  { %125 = vmatpush1.msra.mxu0 %v90_v12  ;;  %409 = vmatprep.subr.mxu1 %v223_v25  ;;  %v205_v35 = vld [vmem:[#allocation8 + $0x50] sm:$0xff]  ;;  %v220_v37 = vld [vmem:[#allocation8 + $0xc8] sm:$0xff]  ;;  %v77_v38 = vld [vmem:[#allocation6 + $0x38] sm:$0xff] }
  0x35   :  { %126 = vmatprep.subr.mxu0 %v89_v13  ;;  %410 = vmatpush3.msra.mxu1 %v207_v27  ;;  %v204_v39 = vld [vmem:[#allocation8 + $0x48] sm:$0xff]  ;;  %v76_v40 = vld [vmem:[#allocation6 + $0x30] sm:$0xff]  ;;  %v219_v41 = vld [vmem:[#allocation8 + $0xc0] sm:$0xff] }
  0x36   :  { %127 = vmatpush1.msra.mxu0 %v88_v14  ;;  %411 = vmatprep.subr.mxu1 %v222_v29  ;;  %v75_v42 = vld [vmem:[#allocation6 + $0x28] sm:$0xff]  ;;  %v203_v43 = vld [vmem:[#allocation8 + $0x40] sm:$0xff]  ;;  %v218_v45 = vld [vmem:[#allocation8 + $0xb8] sm:$0xff] }
  0x37   :  { %128 = vmatprep.subr.mxu0 %v87_v17  ;;  %412 = vmatpush3.msra.mxu1 %v206_v31  ;;  %v74_v44 = vld [vmem:[#allocation6 + $0x20] sm:$0xff]  ;;  %v73_v46 = vld [vmem:[#allocation6 + $0x18] sm:$0xff]  ;;  %v72_v48 = vld [vmem:[#allocation6 + $0x10] sm:$0xff] }
  0x38   :  { %129 = vmatpush1.msra.mxu0 %v86_v20  ;;  %413 = vmatprep.subr.mxu1 %v221_v33  ;;  %v202_v47 = vld [vmem:[#allocation8 + $0x38] sm:$0xff]  ;;  %v217_v49 = vld [vmem:[#allocation8 + $0xb0] sm:$0xff]  ;;  %v71_v50 = vld [vmem:[#allocation6 + $0x8] sm:$0xff] }
  0x39   :  { %130 = vmatprep.subr.mxu0 %v85_v22  ;;  %414 = vmatpush3.msra.mxu1 %v205_v35  ;;  %v201_v51 = vld [vmem:[#allocation8 + $0x30] sm:$0xff]  ;;  %v70_v52 = vld [vmem:[#allocation6] sm:$0xff]  ;;  %v216_v53 = vld [vmem:[#allocation8 + $0xa8] sm:$0xff] }
  0x3a   :  { %131 = vmatpush1.msra.mxu0 %v84_v24  ;;  %415 = vmatprep.subr.mxu1 %v220_v37  ;;  %v605_v54 = vld [vmem:[#allocation3] sm:$0xff]  ;;  %v200_v55 = vld [vmem:[#allocation8 + $0x28] sm:$0xff]  ;;  %v215_v56 = vld [vmem:[#allocation8 + $0xa0] sm:$0xff] }
  0x3b   :  { %132 = vmatprep.subr.mxu0 %v83_v26  ;;  %416 = vmatpush3.msra.mxu1 %v204_v39  ;;  %v199_v57 = vld [vmem:[#allocation8 + $0x20] sm:$0xff]  ;;  %v69_v58 = vld [vmem:[#allocation3 + $0x8] sm:$0xff]  ;;  %v213_v61 = vld [vmem:[#allocation8 + $0x90] sm:$0xff] }
  0x3c   :  { %133 = vmatpush1.msra.mxu0 %v82_v28  ;;  %417 = vmatprep.subr.mxu1 %v219_v41  ;;  %v214_v59 = vld [vmem:[#allocation8 + $0x98] sm:$0xff]  ;;  %v197_v62 = vld [vmem:[#allocation8 + $0x10] sm:$0xff]  ;;  %v212_v63 = vld [vmem:[#allocation8 + $0x88] sm:$0xff] }
  0x3d   :  { %134 = vmatprep.subr.mxu0 %v81_v30  ;;  %418 = vmatpush3.msra.mxu1 %v203_v43  ;;  %v198_v60 = vld [vmem:[#allocation8 + $0x18] sm:$0xff]  ;;  %v196_v1 = vld [vmem:[#allocation8 + $0x8] sm:$0xff]  ;;  %v211_v2 = vld [vmem:[#allocation8 + $0x80] sm:$0xff] }
  0x3e   :  { %135 = vmatpush1.msra.mxu0 %v80_v32  ;;  %419 = vmatprep.subr.mxu1 %v218_v45  ;;  %v195_v3 = vld [vmem:[#allocation8] sm:$0xff]  ;;  %v102_v6 = vld [vmem:[%s630_s2] sm:$0x3] }
  0x3f   :  { %136 = vmatprep.subr.mxu0 %v79_v34  ;;  %420 = vmatpush3.msra.mxu1 %v202_v47  ;;  %v400_v24 = vld [vmem:[%s632_s4] ss:$0 sm:$0xff] }
  0x40   :  { %137 = vmatpush1.msra.mxu0 %v78_v36  ;;  %421 = vmatprep.subr.mxu1 %v217_v49 }
  0x41   :  { %138 = vmatprep.subr.mxu0 %v77_v38  ;;  %422 = vmatpush3.msra.mxu1 %v201_v51 }
  0x42   :  { %139 = vmatpush1.msra.mxu0 %v76_v40  ;;  %423 = vmatprep.subr.mxu1 %v216_v53  ;;  %v401_v53 = vld [vmem:[%s633_s5] ss:$0 sm:$0xff] }
  0x43   :  { %140 = vmatprep.subr.mxu0 %v75_v42  ;;  %424 = vmatpush3.msra.mxu1 %v200_v55  ;;  %v402_v55 = vld [vmem:[%s634_s6] ss:$0 sm:$0xff] }
  0x44   :  { %141 = vmatpush1.msra.mxu0 %v74_v44  ;;  %425 = vmatprep.subr.mxu1 %v215_v56 }
  0x45   :  { %142 = vmatprep.subr.mxu0 %v73_v46  ;;  %426 = vmatpush3.msra.mxu1 %v199_v57 }
  0x46   :  { %143 = vmatpush1.msra.mxu0 %v72_v48  ;;  %427 = vmatprep.subr.mxu1 %v214_v59 }
  0x47   :  { %144 = vmatprep.subr.mxu0 %v71_v50  ;;  %428 = vmatpush3.msra.mxu1 %v198_v60 }
  0x48   :  { %145 = vmatpush1.msra.mxu0 %v70_v52  ;;  %429 = vmatprep.subr.mxu1 %v213_v61 }
  0x49   :  { %179 = vmatmul.mubr.f32.vlgmr.msra.gmra.mxu0 %v605_v54  ;;  %430 = vmatpush3.msra.mxu1 %v197_v62 }
  0x4a   :  { %184 = vmatprep.mubr.f32.mxu0 %v547_v0  ;;  %431 = vmatprep.subr.mxu1 %v212_v63  ;;  %v104_v0 = vlaneseq }
  0x4b   :  { %432 = vmatpush3.msra.mxu1 %v196_v1 }
  0x4c   :  { %433 = vmatprep.subr.mxu1 %v211_v2  ;;  %v105_v4 = vshrl.u32 %v104_v0, 7 }
  0x4d   :  { %185 = vmatmul.mubr.f32.gmra.mxu0 %v69_v58  ;;  %434 = vmatpush3.msra.mxu1 %v195_v3 }
  0x4e   :  { %v106_v5 = vsub.s32 0, %v105_v4  ;;  %v110_v7 = vsub.s32 1, %v105_v4 }
  0x50   :  { %v107_v8 = vrot.slane %v102_v6, %v106_v5  ;;  %v111_v9 = vrot.slane %v102_v6, %v110_v7 }
 0x109   :  { %v180_v10 = vpop.f32.mrf.mxu0 }
 0x10a   :  { %v181_v11 = vadd.f32 %v180_v10, %v107_v8 }
 0x10b   :  { %v182_v12 = vpop.f32.mrf.mxu0 }
 0x10c   :  { %v183_v13 = vadd.f32 %v182_v12, %v111_v9  ;;  %v191_v16 = vmax.f32 %v181_v11, 0.0 }
 0x10d   :  { %v186_v14 = vpop.f32.mrf.mxu0 }
 0x10e   :  { %v192_v15 = vmax.f32 %v183_v13, 0.0  ;;  %v187_v17 = vadd.f32 %v186_v14, %v107_v8 }
 0x10f   :  { %v188_v18 = vpop.f32.mrf.mxu0 }
 0x110   :  { %v189_v19 = vadd.f32 %v188_v18, %v111_v9  ;;  %291 = vmatprep.mubr.f32.mxu1 %v192_v15  ;;  %v193_v21 = vmax.f32 %v187_v17, 0.0 }
 0x111   :  { %292 = vmatmul.mubr.f32.vlgmr.msra.gmra.mxu1 %v191_v16 }
 0x112   :  { %v194_v20 = vmax.f32 %v189_v19, 0.0 }
 0x114   :  { %296 = vmatprep.mubr.f32.mxu1 %v194_v20 }
 0x115   :  { %297 = vmatmul.mubr.f32.gmra.mxu1 %v193_v21 }
 0x1d1   :  { %v435_v22 = vpop.f32.mrf.mxu1 }
 0x1d3   :  { %v436_v23 = vpop.f32.mrf.mxu1 }
 0x1d4   :  { %v437_v25 = vadd.f32 %v436_v23, %v435_v22 }
 0x1d5   :  { %v438_v26 = vpop.f32.mrf.mxu1 }
 0x1d6   :  { %v330_v27 = vadd.f32 %v437_v25, %v400_v24 }
 0x1d7   :  { %v439_v28 = vpop.f32.mrf.mxu1 }
 0x1d8   :  { %v440_v29 = vadd.f32 %v439_v28, %v438_v26  ;;  %v332_v30 = vadd.f32 %v330_v27, %v605_v54 }
 0x1da   :  { %v331_v31 = vadd.f32 %v440_v29, %v400_v24  ;;  %334 = vadd.xlane.f32.xlu0 %v332_v30  ;;  %v338_v32 = vmul.f32 %v332_v30, %v332_v30 }
 0x1dc   :  { %340 = vadd.xlane.f32.xlu1 %v338_v32  ;;  %v333_v33 = vadd.f32 %v331_v31, %v69_v58 }
 0x1de   :  { %336 = vadd.xlane.f32.xlu0 %v333_v33  ;;  %v339_v34 = vmul.f32 %v333_v33, %v333_v33 }
 0x1e0   :  { %342 = vadd.xlane.f32.xlu1 %v339_v34 }
 0x263   :  { %v335_v35 = vpop.xlane.xlu0 %334 }
 0x264   :  { %v344_v36 = vmul.f32 0.0078125, %v335_v35 }
 0x265   :  { %v341_v37 = vpop.xlane.xlu1 %340 }
 0x266   :  { %v348_v38 = vmul.f32 %v344_v36, %v344_v36  ;;  %v346_v39 = vmul.f32 0.0078125, %v341_v37  ;;  %v354_v51 = vsub.f32 %v332_v30, %v344_v36 }
 0x267   :  { %v337_v40 = vpop.xlane.xlu0 %336 }
 0x268   :  { %v350_v41 = vsub.f32 %v346_v39, %v348_v38  ;;  %v345_v42 = vmul.f32 0.0078125, %v337_v40 }
 0x269   :  { %v343_v43 = vpop.xlane.xlu1 %342 }
 0x26a   :  { %v352_v44 = vmax.f32 %v350_v41, 0.0  ;;  %v349_v45 = vmul.f32 %v345_v42, %v345_v42  ;;  %v347_v46 = vmul.f32 0.0078125, %v343_v43  ;;  %v355_v56 = vsub.f32 %v333_v33, %v345_v42 }
 0x26c   :  { %v356_v47 = vadd.f32 1e-06, %v352_v44  ;;  %v351_v48 = vsub.f32 %v347_v46, %v349_v45 }
 0x26e   :  { %450 = vrsqrt.f32 %v356_v47  ;;  %v353_v49 = vmax.f32 %v351_v48, 0.0 }
 0x270   :  { %v357_v50 = vadd.f32 1e-06, %v353_v49 }
 0x272   :  { %452 = vrsqrt.f32 %v357_v50 }
 0x27b   :  { %v451_v52 = vpop.eup %450 }
 0x27c   :  { %v360_v54 = vmul.f32 %v451_v52, %v354_v51 }
 0x27e   :  { %v369_v57 = vmul.f32 %v401_v53, %v360_v54 }
 0x27f   :  { %v453_v58 = vpop.eup %452 }
 0x280   :  { %v361_v59 = vmul.f32 %v453_v58, %v355_v56  ;;  %v378_v60 = vadd.f32 %v402_v55, %v369_v57 }
 0x282   :  { %v370_v61 = vmul.f32 %v401_v53, %v361_v59  ;;  %380 = vst [vmem:[#allocation9] sm:$0xff] %v378_v60 }
 0x284   :  { %v379_v62 = vadd.f32 %v402_v55, %v370_v61 }
 0x286   :  { %381 = vst [vmem:[#allocation9 + $0x8] sm:$0xff] %v379_v62 }
 0x287   :  { %525 = shalt.err (!%p522_p5)
}
 0x288   :  { %393 = dma.vmem_to_hbm [thread:$0]  %s388_s24, 256, %s635_s7, [#allocation5], %s544_s11, %s544_s11, %s545_s12  }
 0x289   :  { %538 = dma.done.wait [#allocation5], 256  }
 0x28a   :  { %539 = vsyncadd [#allocation5], 4294967040 }
 0x28b   :  { %397 = vsyncpa [#allocation4], 1 }
 0x28c   :  { %398 = vsyncpa [#allocation7], 1 }
 0x28d   :  { %399 = vsyncpa [#allocation5], 1 }

// kernel: tpu_custom_call.1
= control target key start
LH: loop header
LB: loop body
LE: loop exit
PB: predicated region body
PF: predicated region fallthrough
CT: control target
= control target key end

     0   :  { %12 = vsyncpa [#allocation4], 0  ;;  %s628_s0 = inlined_call_operand.hbm [shape: f32[16,128], index: 0, kind: input, shape index: {}]   ;;  %s629_s1 = inlined_call_operand.hbm [shape: f32[128,256], index: 1, kind: input, shape index: {}]   ;;  %s630_s2 = inlined_call_operand.vmem [shape: f32[1,256], index: 2, kind: input, shape index: {}]   ;;  %s631_s3 = inlined_call_operand.hbm [shape: f32[256,128], index: 3, kind: input, shape index: {}]   ;;  %s632_s4 = inlined_call_operand.vmem [shape: f32[1,128], index: 4, kind: input, shape index: {}]   ;;  %s633_s5 = inlined_call_operand.vmem [shape: f32[1,128], index: 5, kind: input, shape index: {}]   ;;  %s634_s6 = inlined_call_operand.vmem [shape: f32[1,128], index: 6, kind: input, shape index: {}]   ;;  %s635_s7 = inlined_call_operand.hbm [shape: f32[16,128], index: 7, kind: output, shape index: {}]  }
   0x1   :  { %13 = vsyncpa [#allocation7], 0 }
   0x2   :  { %14 = vsyncpa [#allocation5], 0  ;;  %s540_s24 = smov [#allocation6]  }
   0x3   :  { %s32_s25 = sshll.u32 %s540_s24, 4  ;;  %s33_s25 = int_to_ptr.vmem [resolvable:$true] %s32_s25 }
   0x4   :  { %s462_s26 = scalar_lea.vmem %s33_s25, 4096  ;;  %p467_p1 = scmp.lt.s32.totalorder %s33_s25, %s33_s25 }
   0x5   :  { %p463_p0 = scmp.ne.s32.totalorder %s33_s25, %s462_s26  ;;  %p468_p2 = scmp.lt.s32.totalorder %s462_s26, %s462_s26 }
   0x7   :  { %p469_p3 = por %p468_p2, %p467_p1 }
   0x9   :  { %p470_p4 = pnand %p469_p3, %p463_p0 }
   0xb   :  { %473 = shalt.err (!%p470_p4)
}
   0xc   :  { %s541_s27 = smov 256   ;;  %s542_s28 = smov 16  }
   0xd   :  { %38 = dma.hbm_to_vmem [thread:$0]  %s629_s1, 4096, %s33_s25, [#allocation7], %s541_s27, %s541_s27, %s542_s28  }
   0xe   :  { %s543_s8 = smov [#allocation3]  }
   0xf   :  { %s20_s9 = sshll.u32 %s543_s8, 4  ;;  %s21_s9 = int_to_ptr.vmem [resolvable:$true] %s20_s9 }
  0x10   :  { %s482_s10 = scalar_lea.vmem %s21_s9, 256  ;;  %p487_p6 = scmp.lt.s32.totalorder %s21_s9, %s21_s9 }
  0x11   :  { %p483_p5 = scmp.ne.s32.totalorder %s21_s9, %s482_s10  ;;  %p488_p7 = scmp.lt.s32.totalorder %s482_s10, %s482_s10 }
  0x13   :  { %p489_p8 = por %p488_p7, %p487_p6 }
  0x15   :  { %p490_p9 = pnand %p489_p8, %p483_p5 }
  0x17   :  { %493 = shalt.err (!%p490_p9)
}
  0x18   :  { %s544_s11 = smov 128   ;;  %s545_s12 = smov 8  }
  0x19   :  { %26 = dma.hbm_to_vmem [thread:$0]  %s628_s0, 256, %s21_s9, [#allocation4], %s544_s11, %s544_s11, %s545_s12  }
  0x1a   :  { %s546_s1 = smov [#allocation8]  }
  0x1b   :  { %s46_s15 = sshll.u32 %s546_s1, 4  ;;  %s47_s15 = int_to_ptr.vmem [resolvable:$true] %s46_s15 }
  0x1c   :  { %s502_s16 = scalar_lea.vmem %s47_s15, 4096  ;;  %p507_p11 = scmp.lt.s32.totalorder %s47_s15, %s47_s15 }
  0x1d   :  { %p503_p10 = scmp.ne.s32.totalorder %s47_s15, %s502_s16  ;;  %p508_p12 = scmp.lt.s32.totalorder %s502_s16, %s502_s16 }
  0x1f   :  { %p509_p13 = por %p508_p12, %p507_p11 }
  0x21   :  { %p510_p0 = pnand %p509_p13, %p503_p10 }
  0x23   :  { %513 = shalt.err (!%p510_p0)
}
  0x24   :  { %52 = dma.hbm_to_vmem [thread:$0]  %s631_s3, 4096, %s47_s15, [#allocation7], %s544_s11, %s544_s11, %s545_s12  }
  0x25   :  { %534 = dma.done.wait [#allocation4], 256  }
  0x26   :  { %535 = vsyncadd [#allocation4], 4294967040 }
  0x27   :  { %536 = dma.done.wait [#allocation7], 8192  }
  0x28   :  { %537 = vsyncadd [#allocation7], 4294959104  ;;  %v547_v0 = vmov 0.0   ;;  %v101_v1 = vld [vmem:[#allocation6 + $0xf8] sm:$0xff]  ;;  %v100_v2 = vld [vmem:[#allocation6 + $0xf0] sm:$0xff]  ;;  %s548_s23 = smov [#allocation9]  }
  0x29   :  { %178 = vmatprep.mubr.f32.mxu0 %v547_v0  ;;  %v99_v3 = vld [vmem:[#allocation6 + $0xe8] sm:$0xff]  ;;  %114 = vmatprep.subr.mxu0 %v101_v1  ;;  %v98_v4 = vld [vmem:[#allocation6 + $0xe0] sm:$0xff]  ;;  %v97_v5 = vld [vmem:[#allocation6 + $0xd8] sm:$0xff]  ;;  %s387_s24 = sshll.u32 %s548_s23, 4  ;;  %s388_s24 = int_to_ptr.vmem [resolvable:$true] %s387_s24 }
  0x2a   :  { %115 = vmatpush1.msra.mxu0 %v100_v2  ;;  %v96_v6 = vld [vmem:[#allocation6 + $0xd0] sm:$0xff]  ;;  %v95_v7 = vld [vmem:[#allocation6 + $0xc8] sm:$0xff]  ;;  %v94_v8 = vld [vmem:[#allocation6 + $0xc0] sm:$0xff]  ;;  %s514_s25 = scalar_lea.vmem %s388_s24, 256  ;;  %p519_p2 = scmp.lt.s32.totalorder %s388_s24, %s388_s24 }
  0x2b   :  { %116 = vmatprep.subr.mxu0 %v99_v3  ;;  %v93_v9 = vld [vmem:[#allocation6 + $0xb8] sm:$0xff]  ;;  %v92_v10 = vld [vmem:[#allocation6 + $0xb0] sm:$0xff]  ;;  %v91_v11 = vld [vmem:[#allocation6 + $0xa8] sm:$0xff]  ;;  %p515_p1 = scmp.ne.s32.totalorder %s388_s24, %s514_s25  ;;  %p520_p3 = scmp.lt.s32.totalorder %s514_s25, %s514_s25 }
  0x2c   :  { %117 = vmatpush1.msra.mxu0 %v98_v4  ;;  %v90_v12 = vld [vmem:[#allocation6 + $0xa0] sm:$0xff]  ;;  %v89_v13 = vld [vmem:[#allocation6 + $0x98] sm:$0xff]  ;;  %v88_v14 = vld [vmem:[#allocation6 + $0x90] sm:$0xff] }
  0x2d   :  { %118 = vmatprep.subr.mxu0 %v97_v5  ;;  %v226_v15 = vld [vmem:[#allocation8 + $0xf8] sm:$0xff]  ;;  %v87_v17 = vld [vmem:[#allocation6 + $0x88] sm:$0xff]  ;;  %v225_v18 = vld [vmem:[#allocation8 + $0xf0] sm:$0xff]  ;;  %p521_p4 = por %p520_p3, %p519_p2 }
  0x2e   :  { %119 = vmatpush1.msra.mxu0 %v96_v6  ;;  %v210_v16 = vld [vmem:[#allocation8 + $0x78] sm:$0xff]  ;;  %403 = vmatprep.subr.mxu1 %v226_v15  ;;  %v209_v19 = vld [vmem:[#allocation8 + $0x70] sm:$0xff]  ;;  %v86_v20 = vld [vmem:[#allocation6 + $0x80] sm:$0xff] }
  0x2f   :  { %120 = vmatprep.subr.mxu0 %v95_v7  ;;  %404 = vmatpush3.msra.mxu1 %v210_v16  ;;  %v224_v21 = vld [vmem:[#allocation8 + $0xe8] sm:$0xff]  ;;  %v85_v22 = vld [vmem:[#allocation6 + $0x78] sm:$0xff]  ;;  %v84_v24 = vld [vmem:[#allocation6 + $0x70] sm:$0xff]  ;;  %p522_p5 = pnand %p521_p4, %p515_p1 }
  0x30   :  { %121 = vmatpush1.msra.mxu0 %v94_v8  ;;  %405 = vmatprep.subr.mxu1 %v225_v18  ;;  %v208_v23 = vld [vmem:[#allocation8 + $0x68] sm:$0xff]  ;;  %v223_v25 = vld [vmem:[#allocation8 + $0xe0] sm:$0xff]  ;;  %v222_v29 = vld [vmem:[#allocation8 + $0xd8] sm:$0xff] }
  0x31   :  { %122 = vmatprep.subr.mxu0 %v93_v9  ;;  %406 = vmatpush3.msra.mxu1 %v209_v19  ;;  %v83_v26 = vld [vmem:[#allocation6 + $0x68] sm:$0xff]  ;;  %v207_v27 = vld [vmem:[#allocation8 + $0x60] sm:$0xff]  ;;  %v81_v30 = vld [vmem:[#allocation6 + $0x58] sm:$0xff] }
  0x32   :  { %123 = vmatpush1.msra.mxu0 %v92_v10  ;;  %407 = vmatprep.subr.mxu1 %v224_v21  ;;  %v82_v28 = vld [vmem:[#allocation6 + $0x60] sm:$0xff]  ;;  %v206_v31 = vld [vmem:[#allocation8 + $0x58] sm:$0xff]  ;;  %v80_v32 = vld [vmem:[#allocation6 + $0x50] sm:$0xff] }
  0x33   :  { %124 = vmatprep.subr.mxu0 %v91_v11  ;;  %408 = vmatpush3.msra.mxu1 %v208_v23  ;;  %v221_v33 = vld [vmem:[#allocation8 + $0xd0] sm:$0xff]  ;;  %v79_v34 = vld [vmem:[#allocation6 + $0x48] sm:$0xff]  ;;  %v78_v36 = vld [vmem:[#allocation6 + $0x40] sm:$0xff] }
  0x34   :  { %125 = vmatpush1.msra.mxu0 %v90_v12  ;;  %409 = vmatprep.subr.mxu1 %v223_v25  ;;  %v205_v35 = vld [vmem:[#allocation8 + $0x50] sm:$0xff]  ;;  %v220_v37 = vld [vmem:[#allocation8 + $0xc8] sm:$0xff]  ;;  %v77_v38 = vld [vmem:[#allocation6 + $0x38] sm:$0xff] }
  0x35   :  { %126 = vmatprep.subr.mxu0 %v89_v13  ;;  %410 = vmatpush3.msra.mxu1 %v207_v27  ;;  %v204_v39 = vld [vmem:[#allocation8 + $0x48] sm:$0xff]  ;;  %v76_v40 = vld [vmem:[#allocation6 + $0x30] sm:$0xff]  ;;  %v219_v41 = vld [vmem:[#allocation8 + $0xc0] sm:$0xff] }
  0x36   :  { %127 = vmatpush1.msra.mxu0 %v88_v14  ;;  %411 = vmatprep.subr.mxu1 %v222_v29  ;;  %v75_v42 = vld [vmem:[#allocation6 + $0x28] sm:$0xff]  ;;  %v203_v43 = vld [vmem:[#allocation8 + $0x40] sm:$0xff]  ;;  %v218_v45 = vld [vmem:[#allocation8 + $0xb8] sm:$0xff] }
  0x37   :  { %128 = vmatprep.subr.mxu0 %v87_v17  ;;  %412 = vmatpush3.msra.mxu1 %v206_v31  ;;  %v74_v44 = vld [vmem:[#allocation6 + $0x20] sm:$0xff]  ;;  %v73_v46 = vld [vmem:[#allocation6 + $0x18] sm:$0xff]  ;;  %v72_v48 = vld [vmem:[#allocation6 + $0x10] sm:$0xff] }
  0x38   :  { %129 = vmatpush1.msra.mxu0 %v86_v20  ;;  %413 = vmatprep.subr.mxu1 %v221_v33  ;;  %v202_v47 = vld [vmem:[#allocation8 + $0x38] sm:$0xff]  ;;  %v217_v49 = vld [vmem:[#allocation8 + $0xb0] sm:$0xff]  ;;  %v71_v50 = vld [vmem:[#allocation6 + $0x8] sm:$0xff] }
  0x39   :  { %130 = vmatprep.subr.mxu0 %v85_v22  ;;  %414 = vmatpush3.msra.mxu1 %v205_v35  ;;  %v201_v51 = vld [vmem:[#allocation8 + $0x30] sm:$0xff]  ;;  %v70_v52 = vld [vmem:[#allocation6] sm:$0xff]  ;;  %v216_v53 = vld [vmem:[#allocation8 + $0xa8] sm:$0xff] }
  0x3a   :  { %131 = vmatpush1.msra.mxu0 %v84_v24  ;;  %415 = vmatprep.subr.mxu1 %v220_v37  ;;  %v605_v54 = vld [vmem:[#allocation3] sm:$0xff]  ;;  %v200_v55 = vld [vmem:[#allocation8 + $0x28] sm:$0xff]  ;;  %v215_v56 = vld [vmem:[#allocation8 + $0xa0] sm:$0xff] }
  0x3b   :  { %132 = vmatprep.subr.mxu0 %v83_v26  ;;  %416 = vmatpush3.msra.mxu1 %v204_v39  ;;  %v199_v57 = vld [vmem:[#allocation8 + $0x20] sm:$0xff]  ;;  %v69_v58 = vld [vmem:[#allocation3 + $0x8] sm:$0xff]  ;;  %v213_v61 = vld [vmem:[#allocation8 + $0x90] sm:$0xff] }
  0x3c   :  { %133 = vmatpush1.msra.mxu0 %v82_v28  ;;  %417 = vmatprep.subr.mxu1 %v219_v41  ;;  %v214_v59 = vld [vmem:[#allocation8 + $0x98] sm:$0xff]  ;;  %v197_v62 = vld [vmem:[#allocation8 + $0x10] sm:$0xff]  ;;  %v212_v63 = vld [vmem:[#allocation8 + $0x88] sm:$0xff] }
  0x3d   :  { %134 = vmatprep.subr.mxu0 %v81_v30  ;;  %418 = vmatpush3.msra.mxu1 %v203_v43  ;;  %v198_v60 = vld [vmem:[#allocation8 + $0x18] sm:$0xff]  ;;  %v196_v1 = vld [vmem:[#allocation8 + $0x8] sm:$0xff]  ;;  %v211_v2 = vld [vmem:[#allocation8 + $0x80] sm:$0xff] }
  0x3e   :  { %135 = vmatpush1.msra.mxu0 %v80_v32  ;;  %419 = vmatprep.subr.mxu1 %v218_v45  ;;  %v195_v3 = vld [vmem:[#allocation8] sm:$0xff]  ;;  %v102_v6 = vld [vmem:[%s630_s2] sm:$0x3] }
  0x3f   :  { %136 = vmatprep.subr.mxu0 %v79_v34  ;;  %420 = vmatpush3.msra.mxu1 %v202_v47  ;;  %v400_v24 = vld [vmem:[%s632_s4] ss:$0 sm:$0xff] }
  0x40   :  { %137 = vmatpush1.msra.mxu0 %v78_v36  ;;  %421 = vmatprep.subr.mxu1 %v217_v49 }
  0x41   :  { %138 = vmatprep.subr.mxu0 %v77_v38  ;;  %422 = vmatpush3.msra.mxu1 %v201_v51 }
  0x42   :  { %139 = vmatpush1.msra.mxu0 %v76_v40  ;;  %423 = vmatprep.subr.mxu1 %v216_v53  ;;  %v401_v53 = vld [vmem:[%s633_s5] ss:$0 sm:$0xff] }
  0x43   :  { %140 = vmatprep.subr.mxu0 %v75_v42  ;;  %424 = vmatpush3.msra.mxu1 %v200_v55  ;;  %v402_v55 = vld [vmem:[%s634_s6] ss:$0 sm:$0xff] }
  0x44   :  { %141 = vmatpush1.msra.mxu0 %v74_v44  ;;  %425 = vmatprep.subr.mxu1 %v215_v56 }
  0x45   :  { %142 = vmatprep.subr.mxu0 %v73_v46  ;;  %426 = vmatpush3.msra.mxu1 %v199_v57 }
  0x46   :  { %143 = vmatpush1.msra.mxu0 %v72_v48  ;;  %427 = vmatprep.subr.mxu1 %v214_v59 }
  0x47   :  { %144 = vmatprep.subr.mxu0 %v71_v50  ;;  %428 = vmatpush3.msra.mxu1 %v198_v60 }
  0x48   :  { %145 = vmatpush1.msra.mxu0 %v70_v52  ;;  %429 = vmatprep.subr.mxu1 %v213_v61 }
  0x49   :  { %179 = vmatmul.mubr.f32.vlgmr.msra.gmra.mxu0 %v605_v54  ;;  %430 = vmatpush3.msra.mxu1 %v197_v62 }
  0x4a   :  { %184 = vmatprep.mubr.f32.mxu0 %v547_v0  ;;  %431 = vmatprep.subr.mxu1 %v212_v63  ;;  %v104_v0 = vlaneseq }
  0x4b   :  { %432 = vmatpush3.msra.mxu1 %v196_v1 }
  0x4c   :  { %433 = vmatprep.subr.mxu1 %v211_v2  ;;  %v105_v4 = vshrl.u32 %v104_v0, 7 }
  0x4d   :  { %185 = vmatmul.mubr.f32.gmra.mxu0 %v69_v58  ;;  %434 = vmatpush3.msra.mxu1 %v195_v3 }
  0x4e   :  { %v106_v5 = vsub.s32 0, %v105_v4  ;;  %v110_v7 = vsub.s32 1, %v105_v4 }
  0x50   :  { %v107_v8 = vrot.slane %v102_v6, %v106_v5  ;;  %v111_v9 = vrot.slane %v102_v6, %v110_v7 }
 0x109   :  { %v180_v10 = vpop.f32.mrf.mxu0 }
 0x10a   :  { %v181_v11 = vadd.f32 %v180_v10, %v107_v8 }
 0x10b   :  { %v182_v12 = vpop.f32.mrf.mxu0 }
 0x10c   :  { %v183_v13 = vadd.f32 %v182_v12, %v111_v9  ;;  %v191_v16 = vmax.f32 %v181_v11, 0.0 }
 0x10d   :  { %v186_v14 = vpop.f32.mrf.mxu0 }
 0x10e   :  { %v192_v15 = vmax.f32 %v183_v13, 0.0  ;;  %v187_v17 = vadd.f32 %v186_v14, %v107_v8 }
 0x10f   :  { %v188_v18 = vpop.f32.mrf.mxu0 }
 0x110   :  { %v189_v19 = vadd.f32 %v188_v18, %v111_v9  ;;  %291 = vmatprep.mubr.f32.mxu1 %v192_v15  ;;  %v193_v21 = vmax.f32 %v187_v17, 0.0 }
 0x111   :  { %292 = vmatmul.mubr.f32.vlgmr.msra.gmra.mxu1 %v191_v16 }
 0x112   :  { %v194_v20 = vmax.f32 %v189_v19, 0.0 }
 0x114   :  { %296 = vmatprep.mubr.f32.mxu1 %v194_v20 }
 0x115   :  { %297 = vmatmul.mubr.f32.gmra.mxu1 %v193_v21 }
 0x1d1   :  { %v435_v22 = vpop.f32.mrf.mxu1 }
 0x1d3   :  { %v436_v23 = vpop.f32.mrf.mxu1 }
 0x1d4   :  { %v437_v25 = vadd.f32 %v436_v23, %v435_v22 }
 0x1d5   :  { %v438_v26 = vpop.f32.mrf.mxu1 }
 0x1d6   :  { %v330_v27 = vadd.f32 %v437_v25, %v400_v24 }
 0x1d7   :  { %v439_v28 = vpop.f32.mrf.mxu1 }
 0x1d8   :  { %v440_v29 = vadd.f32 %v439_v28, %v438_v26  ;;  %v332_v30 = vadd.f32 %v330_v27, %v605_v54 }
 0x1da   :  { %v331_v31 = vadd.f32 %v440_v29, %v400_v24  ;;  %334 = vadd.xlane.f32.xlu0 %v332_v30  ;;  %v338_v32 = vmul.f32 %v332_v30, %v332_v30 }
 0x1dc   :  { %340 = vadd.xlane.f32.xlu1 %v338_v32  ;;  %v333_v33 = vadd.f32 %v331_v31, %v69_v58 }
 0x1de   :  { %336 = vadd.xlane.f32.xlu0 %v333_v33  ;;  %v339_v34 = vmul.f32 %v333_v33, %v333_v33 }
 0x1e0   :  { %342 = vadd.xlane.f32.xlu1 %v339_v34 }
 0x263   :  { %v335_v35 = vpop.xlane.xlu0 %334 }
 0x264   :  { %v344_v36 = vmul.f32 0.0078125, %v335_v35 }
 0x265   :  { %v341_v37 = vpop.xlane.xlu1 %340 }
 0x266   :  { %v348_v38 = vmul.f32 %v344_v36, %v344_v36  ;;  %v346_v39 = vmul.f32 0.0078125, %v341_v37  ;;  %v354_v51 = vsub.f32 %v332_v30, %v344_v36 }
 0x267   :  { %v337_v40 = vpop.xlane.xlu0 %336 }
 0x268   :  { %v350_v41 = vsub.f32 %v346_v39, %v348_v38  ;;  %v345_v42 = vmul.f32 0.0078125, %v337_v40 }
 0x269   :  { %v343_v43 = vpop.xlane.xlu1 %342 }
 0x26a   :  { %v352_v44 = vmax.f32 %v350_v41, 0.0  ;;  %v349_v45 = vmul.f32 %v345_v42, %v345_v42  ;;  %v347_v46 = vmul.f32 0.0078125, %v343_v43  ;;  %v355_v56 = vsub.f32 %v333_v33, %v345_v42 }
 0x26c   :  { %v356_v47 = vadd.f32 1e-06, %v352_v44  ;;  %v351_v48 = vsub.f32 %v347_v46, %v349_v45 }
 0x26e   :  { %450 = vrsqrt.f32 %v356_v47  ;;  %v353_v49 = vmax.f32 %v351_v48, 0.0 }
 0x270   :  { %v357_v50 = vadd.f32 1e-06, %v353_v49 }
 0x272   :  { %452 = vrsqrt.f32 %v357_v50 }
 0x27b   :  { %v451_v52 = vpop.eup %450 }
 0x27c   :  { %v360_v54 = vmul.f32 %v451_v52, %v354_v51 }
 0x27e   :  { %v369_v57 = vmul.f32 %v401_v53, %v360_v54 }
 0x27f   :  { %v453_v58 = vpop.eup %452 }
 0x280   :  { %v361_v59 = vmul.f32 %v453_v58, %v355_v56  ;;  %v378_v60 = vadd.f32 %v402_v55, %v369_v57 }
 0x282   :  { %v370_v61 = vmul.f32 %v401_v53, %v361_v59  ;;  %380 = vst [vmem:[#allocation9] sm:$0xff] %v378_v60 }
 0x284   :  { %v379_v62 = vadd.f32 %v402_v55, %v370_v61 }
 0x286   :  { %381 = vst [vmem:[#allocation9 + $0x8] sm:$0xff] %v379_v62 }
 0x287   :  { %525 = shalt.err (!%p522_p5)
}
 0x288   :  { %393 = dma.vmem_to_hbm [thread:$0]  %s388_s24, 256, %s635_s7, [#allocation5], %s544_s11, %s544_s11, %s545_s12  }
 0x289   :  { %538 = dma.done.wait [#allocation5], 256  }
 0x28a   :  { %539 = vsyncadd [#allocation5], 4294967040 }
 0x28b   :  { %397 = vsyncpa [#allocation4], 1 }
 0x28c   :  { %398 = vsyncpa [#allocation7], 1 }
 0x28d   :  { %399 = vsyncpa [#allocation5], 1 }

</bundles_post_ra>
